<compile_context>
chip_gen: v7x
topology: tpu7x:2x2x1
jax: 0.10.0
libtpu: 0.0.40
codegen_flags: <defaults>
</compile_context>

<pallas_src>
import jax
import jax.numpy as jnp
from jax.experimental import pallas as pl
from jax.experimental.pallas import tpu as pltpu

_LANES = 128            # lane-dense last dim; 128 already gives unmasked full-width vst
_MAX_TILE_ROWS = 8192   # (8192, 128) f32 tile = 4 MiB per buffer


def _linear_kernel(w_ref, b_ref, x_ref, o_ref):
    # w_ref: SMEM (1, 1) scalar weight; b_ref: SMEM (1,) scalar bias.
    # x_ref / o_ref: VMEM (tile_rows, 128) lane-dense tiles.
    w = w_ref[0, 0]
    b = b_ref[0]
    o_ref[...] = x_ref[...] * w + b  # single VPU multiply-add per vreg; HBM-bandwidth bound.


def linear_regression_forward(x: jnp.ndarray, weight: jnp.ndarray, bias: jnp.ndarray) -> jnp.ndarray:
    """x: (N, 1) f32, weight: (1, 1) f32, bias: (1,) f32 -> (N, 1) f32."""
    n, in_f = x.shape
    assert in_f == 1 and weight.shape == (1, 1) and bias.shape == (1,)
    # Note: for genuinely tiny N, plain `x * weight[0, 0] + bias[0]` in XLA beats kernel
    # launch overhead; we always run the Pallas kernel here to exercise it.

    rows = pl.cdiv(n, _LANES)
    padded = rows * _LANES

    flat = x.reshape(-1)                  # (N, 1) -> (N,): free view
    needs_pad = padded != n
    if needs_pad:
        # Lane-dim raggedness (N % 128 != 0) cannot be expressed as a zero-copy view;
        # pad to the next multiple of 128 and slice the tail off afterwards.  The
        # performance-relevant large-batch case (N % 128 == 0) takes the zero-copy path.
        flat = jnp.pad(flat, (0, padded - n))
    x2 = flat.reshape(rows, _LANES)       # (rows, 128): free view when no pad

    # Row-block size: whole array if it fits in one 4 MiB tile, else 8192-row tiles.
    # Either choice satisfies the (8,128) BlockSpec rule (equals the full dim, or is a
    # multiple of 8).  A ragged final row-block is masked by Pallas — no row padding.
    tile_rows = rows if rows <= _MAX_TILE_ROWS else _MAX_TILE_ROWS
    grid = (pl.cdiv(rows, tile_rows),)

    out2 = pl.pallas_call(
        _linear_kernel,
        out_shape=jax.ShapeDtypeStruct((rows, _LANES), x.dtype),
        grid=grid,
        in_specs=[
            pl.BlockSpec(memory_space=pltpu.SMEM),                 # weight (1, 1)
            pl.BlockSpec(memory_space=pltpu.SMEM),                 # bias (1,)
            pl.BlockSpec((tile_rows, _LANES), lambda i: (i, 0)),   # x tile (lane-dense)
        ],
        out_specs=pl.BlockSpec((tile_rows, _LANES), lambda i: (i, 0)),
        compiler_params=pltpu.CompilerParams(
            # Rows independent -> shard the row grid across v7x's 2 TCs; neutral on
            # single-TC v5e/v6e.  (pltpu.CORE_PARALLEL is a v7x-only alternative.)
            dimension_semantics=("parallel",),
            vmem_limit_bytes=40 * 1024 * 1024,   # ~16 MiB live (4 bufs x 4 MiB) + headroom
        ),
        cost_estimate=pl.CostEstimate(
            flops=2 * padded, transcendentals=0, bytes_accessed=8 * padded),
    )(weight, bias, x2)

    out_flat = out2.reshape(-1)           # free view
    if needs_pad:
        out_flat = out_flat[:n]           # only on the unaligned fallback path
    return out_flat.reshape(n, 1)         # free view


if __name__ == "__main__":
    # Deterministic parameters (shapes from nn.Linear(1, 1)).
    weight = jnp.array([[0.7]], dtype=jnp.float32)   # (out_features, in_features)
    bias = jnp.array([0.3], dtype=jnp.float32)       # (out_features,)

    key = jax.random.PRNGKey(0)
    k_small, k_aligned = jax.random.split(key)

    # Small deterministic input, batch = 8 (unaligned -> exercises the fallback path).
    x = jax.random.normal(k_small, (8, 1), dtype=jnp.float32)
    y = jax.block_until_ready(linear_regression_forward(x, weight, bias))
    y_ref = x @ weight.T + bias
    assert y.shape == y_ref.shape, "shape mismatch vs reference"
    assert jnp.allclose(y, y_ref, atol=1e-6), "mismatch vs reference"

    # Aligned batch (N % 128 == 0) -> exercises the zero-copy (no pad / no slice) path.
    x2 = jax.random.normal(k_aligned, (256, 1), dtype=jnp.float32)
    y2 = jax.block_until_ready(linear_regression_forward(x2, weight, bias))
    y2_ref = x2 @ weight.T + bias
    assert jnp.allclose(y2, y2_ref, atol=1e-6), "mismatch vs reference (aligned path)"

    print("KERNEL_OK")
</pallas_src>

<mosaic_0001>
module attributes {stable_mosaic.version = 11 : i64} {
  func.func @_linear_kernel(%arg0: i32, %arg1: memref<1x1xf32, #tpu.memory_space<smem>>, %arg2: memref<1xf32, #tpu.memory_space<smem>>, %arg3: memref<1x128xf32, #tpu.memory_space<vmem>>, %arg4: memref<1x128xf32, #tpu.memory_space<vmem>>) attributes {dimension_semantics = [#tpu.dimension_semantics<parallel>], iteration_bounds = array<i64: 1>, scalar_prefetch = 0 : i64, scratch_operands = 0 : i64, tpu.core_type = #tpu.core_type<tc>, window_params = [{transform_indices = @transform_0, window_bounds = array<i64: 1, 1>}, {transform_indices = @transform_1, window_bounds = array<i64: 1>}, {transform_indices = @transform_2, window_bounds = array<i64: 1, 128>}, {transform_indices = @transform_3, window_bounds = array<i64: 1, 128>}]} {
    %c0 = arith.constant 0 : index
    %c0_0 = arith.constant 0 : index
    %0 = memref.load %arg1[%c0, %c0_0] : memref<1x1xf32, #tpu.memory_space<smem>>
    %c0_1 = arith.constant 0 : index
    %1 = memref.load %arg2[%c0_1] : memref<1xf32, #tpu.memory_space<smem>>
    %c0_2 = arith.constant 0 : index
    %c0_3 = arith.constant 0 : index
    %2 = vector.load %arg3[%c0_2, %c0_3] : memref<1x128xf32, #tpu.memory_space<vmem>>, vector<1x128xf32>
    %3 = vector.broadcast %0 : f32 to vector<1x128xf32>
    %4 = arith.mulf %2, %3 : vector<1x128xf32>
    %5 = vector.broadcast %1 : f32 to vector<1x128xf32>
    %6 = arith.addf %4, %5 : vector<1x128xf32>
    %c0_4 = arith.constant 0 : index
    %c0_5 = arith.constant 0 : index
    %7 = vector.load %arg4[%c0_4, %c0_5] : memref<1x128xf32, #tpu.memory_space<vmem>>, vector<1x128xf32>
    tpu.vector_store %arg4[%c0_4, %c0_5], %6 {strides = array<i32>} : memref<1x128xf32, #tpu.memory_space<vmem>>, vector<1x128xf32>,
    return
  }
  func.func @transform_0(%arg0: i32) -> (i32, i32) {
    %c0_i32 = arith.constant 0 : i32
    %c0_i32_0 = arith.constant 0 : i32
    %c0_i32_1 = arith.constant 0 : i32
    return %c0_i32, %c0_i32_0 : i32, i32
  }
  func.func @transform_1(%arg0: i32) -> i32 {
    %c0_i32 = arith.constant 0 : i32
    %c0_i32_0 = arith.constant 0 : i32
    return %c0_i32 : i32
  }
  func.func @transform_2(%arg0: i32) -> (i32, i32) {
    %c0_i32 = arith.constant 0 : i32
    %c0_i32_0 = arith.constant 0 : i32
    return %arg0, %c0_i32 : i32, i32
  }
  func.func @transform_3(%arg0: i32) -> (i32, i32) {
    %c0_i32 = arith.constant 0 : i32
    %c0_i32_0 = arith.constant 0 : i32
    return %arg0, %c0_i32 : i32, i32
  }
}

</mosaic_0001>

<bundles_post_ra>
// kernel: tpu_custom_call.1
= control target key start
LH: loop header
LB: loop body
LE: loop exit
PB: predicated region body
PF: predicated region fallthrough
CT: control target
= control target key end

     0   :  { %s106_s0 = inlined_call_operand.<no memory space> [shape: f32[1,1], index: 0, kind: input, shape index: {}]   ;;  %s107_s1 = inlined_call_operand.<no memory space> [shape: f32[1], index: 1, kind: input, shape index: {}]   ;;  %s108_s2 = inlined_call_operand.vmem [shape: f32[1,128], index: 2, kind: input, shape index: {}]   ;;  %s109_s3 = inlined_call_operand.hbm [shape: f32[1,128], index: 3, kind: output, shape index: {}]  }
   0x1   :  { %v19_v0 = vld [vmem:[%s108_s2] sm:$0x1]  ;;  %v20_v1 = vstv %s106_s0  ;;  %v22_v2 = vstv %s107_s1 }
   0x2   :  { %10 = vsyncpa [#allocation5], 0  ;;  %v21_v3 = vmul.f32 %v20_v1, %v19_v0  ;;  %s64_s18 = smov [#allocation4]  }
   0x3   :  { %s31_s19 = sshll.u32 %s64_s18, 4  ;;  %s32_s19 = int_to_ptr.vmem [resolvable:$true] %s31_s19 }
   0x4   :  { %v23_v4 = vadd.f32 %v22_v2, %v21_v3  ;;  %s40_s20 = scalar_lea.vmem %s32_s19, 16  ;;  %s44_s21 = scalar_lea.vmem %s32_s19, 32 }
   0x5   :  { %p41_p0 = scmp.ne.s32.totalorder %s32_s19, %s40_s20  ;;  %p45_p1 = scmp.lt.s32.totalorder %s32_s19, %s32_s19 }
   0x6   :  { %24 = vst [vmem:[#allocation4] sm:$0x1] %v23_v4  ;;  %p46_p2 = scmp.lt.s32.totalorder %s44_s21, %s40_s20 }
   0x8   :  { %p47_p3 = por %p46_p2, %p45_p1 }
   0xa   :  { %p48_p4 = pnand %p47_p3, %p41_p0 }
   0xc   :  { %51 = shalt.err (!%p48_p4)
}
   0xd   :  { %s52_s22 = scalar_lea.hbm %s109_s3, 16 }
   0xe   :  { %p53_p5 = scmp.ne.s32.totalorder %s109_s3, %s52_s22  ;;  %p56_p6 = scmp.lt.u32.totalorder %s52_s22, %s109_s3 }
  0x10   :  { %p58_p7 = pnand %p56_p6, %p53_p5 }
  0x12   :  { %61 = shalt.err (!%p58_p7)
}
  0x13   :  { %34 = dma.vmem_to_hbm [thread:$0]  %s32_s19, 16, %s109_s3, [#allocation5]  }
  0x14   :  { %62 = dma.done.wait [#allocation5], 16  }
  0x15   :  { %63 = vsyncadd [#allocation5], 4294967280 }
  0x16   :  { %38 = vsyncpa [#allocation5], 1 }

</bundles_post_ra>
